<compile_context>
chip_gen: v7x
topology: tpu7x:2x2x1
jax: 0.10.0
libtpu: 0.0.40
codegen_flags: <defaults>
</compile_context>

<pallas_src>
import jax
import jax.numpy as jnp
from jax.experimental import pallas as pl
from jax.experimental.pallas import tpu as pltpu


def _vmem_limit(needed_bytes):
    # Explicit scoped-VMEM budget: enough for the computed footprint + margin,
    # never below the v6e/v7x default (32 MiB), never above v7x physical (64 MiB).
    return int(min(max(needed_bytes + (4 << 20), 32 << 20), 64 << 20))


def _pack_pooled(avg, mx):
    # Build the (C, 2) pooled-stats matrix without a lane concatenate:
    # column 0 = avg, column 1 = max.
    C = avg.shape[0]
    col = jax.lax.broadcasted_iota(jnp.int32, (C, 2), 1)
    return jnp.where(col == 0, avg, mx)


def _gate_from_pooled(pooled, w1f, w2f):
    # Fused MLP: one W1 matmul over both branches, relu, one W2 matmul,
    # sum the two branch columns, sigmoid.  (Cr, 2) / (C, 2) intermediates.
    h = jnp.maximum(jnp.dot(w1f, pooled, preferred_element_type=jnp.float32), 0.0)
    z = jnp.dot(w2f, h, preferred_element_type=jnp.float32)
    return jax.nn.sigmoid(jnp.sum(z, axis=-1, keepdims=True))          # (C, 1)


# ---------------------------------------------------------------------------
# Fast path: one (C, HW_pad) slab per batch element, fully fused.
# ---------------------------------------------------------------------------
def _single_pass_call(x_flat, w1, w2, hw_true):
    B, C, hw_pad = x_flat.shape
    Cr = w1.shape[0]
    itemsize = x_flat.dtype.itemsize
    slab = C * hw_pad * itemsize
    w_bytes = w1.size * w1.dtype.itemsize + w2.size * w2.dtype.itemsize
    # 2x double-buffered input + 2x double-buffered output + weights + f32 temps.
    needed = 4 * slab + 2 * w_bytes + C * hw_pad * 4

    def kernel(x_ref, w1_ref, w2_ref, o_ref):
        x = x_ref[...]                                                  # (C, hw_pad)
        xf = x if x.dtype == jnp.float32 else x.astype(jnp.float32)
        s = jnp.sum(xf, axis=-1, keepdims=True)                         # zero-pad safe
        if hw_pad == hw_true:
            mx = jnp.max(xf, axis=-1, keepdims=True)
        else:
            lane = jax.lax.broadcasted_iota(jnp.int32, xf.shape, 1)
            mx = jnp.max(jnp.where(lane < hw_true, xf, -jnp.inf),
                         axis=-1, keepdims=True)
        avg = s * (1.0 / hw_true)
        pooled = _pack_pooled(avg, mx)                                  # (C, 2)
        gate = _gate_from_pooled(pooled,
                                 w1_ref[...].astype(jnp.float32),
                                 w2_ref[...].astype(jnp.float32))       # (C, 1)
        o_ref[...] = (xf * gate).astype(o_ref.dtype)

    return pl.pallas_call(
        kernel,
        out_shape=jax.ShapeDtypeStruct((B, C, hw_pad), x_flat.dtype),
        grid_spec=pltpu.PrefetchScalarGridSpec(
            num_scalar_prefetch=0,
            grid=(B,),
            in_specs=[
                pl.BlockSpec((pl.Squeezed(), C, hw_pad), lambda b: (b, 0, 0)),
                pl.BlockSpec((Cr, C), lambda b: (0, 0)),
                pl.BlockSpec((C, Cr), lambda b: (0, 0)),
            ],
            out_specs=pl.BlockSpec((pl.Squeezed(), C, hw_pad), lambda b: (b, 0, 0)),
        ),
        compiler_params=pltpu.CompilerParams(
            dimension_semantics=("parallel",),
            vmem_limit_bytes=_vmem_limit(needed),
        ),
    )(x_flat, w1, w2)


# ---------------------------------------------------------------------------
# Large-slab fallback: two passes.
#   Pass 1: HW-tiled sum/max reduction + gate (grid (B, T), T = "arbitrary").
#   Pass 2: lane-dense elementwise scale   (grid (B, T), both "parallel").
# ---------------------------------------------------------------------------
def _two_pass_call(x_flat, w1, w2, hw_true, tile_bytes):
    B, C, hw_pad = x_flat.shape
    Cr = w1.shape[0]
    itemsize = x_flat.dtype.itemsize

    # Pick the largest multiple-of-128 HW tile that divides hw_pad and keeps the
    # (C, hw_tile) block under the byte budget.
    n128 = hw_pad // 128
    max_d = max(1, tile_bytes // (C * 128 * itemsize))
    d = 1
    for cand in range(1, n128 + 1):
        if n128 % cand == 0 and cand <= max_d:
            d = cand
    hw_tile = d * 128
    n_tiles = hw_pad // hw_tile
    tile_b = C * hw_tile * itemsize
    w_bytes = w1.size * w1.dtype.itemsize + w2.size * w2.dtype.itemsize
    needs_mask = hw_pad != hw_true

    # ---- Pass 1: pooling + gate -------------------------------------------
    def pool_gate_kernel(x_ref, w1_ref, w2_ref, gate_ref, sum_acc, max_acc):
        t = pl.program_id(1)

        @pl.when(t == 0)
        def _():
            sum_acc[...] = jnp.zeros_like(sum_acc)
            max_acc[...] = jnp.full_like(max_acc, -jnp.inf)

        x = x_ref[...]                                                  # (C, hw_tile)
        xf = x if x.dtype == jnp.float32 else x.astype(jnp.float32)

        sum_acc[...] += jnp.sum(xf, axis=-1, keepdims=True)
        if needs_mask:
            lane = jax.lax.broadcasted_iota(jnp.int32, xf.shape, 1) + t * hw_tile
            tile_max = jnp.max(jnp.where(lane < hw_true, xf, -jnp.inf),
                               axis=-1, keepdims=True)
        else:
            tile_max = jnp.max(xf, axis=-1, keepdims=True)
        max_acc[...] = jnp.maximum(max_acc[...], tile_max)

        @pl.when(t == pl.num_programs(1) - 1)
        def _():
            avg = sum_acc[...] * (1.0 / hw_true)
            pooled = _pack_pooled(avg, max_acc[...])
            gate_ref[...] = _gate_from_pooled(pooled,
                                              w1_ref[...].astype(jnp.float32),
                                              w2_ref[...].astype(jnp.float32))

    gate = pl.pallas_call(
        pool_gate_kernel,
        out_shape=jax.ShapeDtypeStruct((B, C, 1), jnp.float32),
        grid_spec=pltpu.PrefetchScalarGridSpec(
            num_scalar_prefetch=0,
            grid=(B, n_tiles),
            in_specs=[
                pl.BlockSpec((pl.Squeezed(), C, hw_tile), lambda b, t: (b, 0, t)),
                pl.BlockSpec((Cr, C), lambda b, t: (0, 0)),
                pl.BlockSpec((C, Cr), lambda b, t: (0, 0)),
            ],
            out_specs=pl.BlockSpec((pl.Squeezed(), C, 1), lambda b, t: (b, 0, 0)),
            scratch_shapes=[
                pltpu.VMEM((C, 1), jnp.float32),   # running sum
                pltpu.VMEM((C, 1), jnp.float32),   # running max
            ],
        ),
        compiler_params=pltpu.CompilerParams(
            dimension_semantics=("parallel", "arbitrary"),
            vmem_limit_bytes=_vmem_limit(2 * tile_b + 2 * w_bytes + C * hw_tile * 4),
        ),
    )(x_flat, w1, w2)

    # ---- Pass 2: lane-dense scale ------------------------------------------
    def scale_kernel(x_ref, gate_ref, o_ref):
        x = x_ref[...]
        xf = x if x.dtype == jnp.float32 else x.astype(jnp.float32)
        o_ref[...] = (xf * gate_ref[...]).astype(o_ref.dtype)

    out_flat = pl.pallas_call(
        scale_kernel,
        out_shape=jax.ShapeDtypeStruct((B, C, hw_pad), x_flat.dtype),
        grid_spec=pltpu.PrefetchScalarGridSpec(
            num_scalar_prefetch=0,
            grid=(B, n_tiles),
            in_specs=[
                pl.BlockSpec((pl.Squeezed(), C, hw_tile), lambda b, t: (b, 0, t)),
                pl.BlockSpec((pl.Squeezed(), C, 1), lambda b, t: (b, 0, 0)),
            ],
            out_specs=pl.BlockSpec((pl.Squeezed(), C, hw_tile), lambda b, t: (b, 0, t)),
        ),
        compiler_params=pltpu.CompilerParams(
            dimension_semantics=("parallel", "parallel"),
            vmem_limit_bytes=_vmem_limit(4 * tile_b + C * hw_tile * 4),
        ),
    )(x_flat, gate)

    return out_flat


# ---------------------------------------------------------------------------
# Public wrapper
# ---------------------------------------------------------------------------
def channel_attention(x, w1, w2, *,
                      single_pass_max_slab_bytes=8 << 20,
                      force_two_pass=False,
                      two_pass_tile_bytes=2 << 20):
    """x: (B, C, H, W); w1: (C//r, C); w2: (C, C//r) -> (B, C, H, W)."""
    B, C, H, W = x.shape
    hw_true = H * W
    hw_pad = ((hw_true + 127) // 128) * 128        # lane-dense stores

    x_flat = x.reshape(B, C, hw_true)
    if hw_pad != hw_true:
        # Zero padding: harmless for the sum; the max is masked in-kernel.
        x_flat = jnp.pad(x_flat, ((0, 0), (0, 0), (0, hw_pad - hw_true)))

    slab_bytes = C * hw_pad * x.dtype.itemsize
    if force_two_pass or slab_bytes > single_pass_max_slab_bytes:
        out_flat = _two_pass_call(x_flat, w1, w2, hw_true, two_pass_tile_bytes)
    else:
        out_flat = _single_pass_call(x_flat, w1, w2, hw_true)

    if hw_pad != hw_true:
        out_flat = out_flat[:, :, :hw_true]
    return out_flat.reshape(B, C, H, W)


def channel_attention_ref(x, w1, w2):
    # Pure-JAX reference mirroring the PyTorch forward.
    avg = jnp.mean(x, axis=(2, 3))                    # (B, C)
    mx = jnp.max(x, axis=(2, 3))                      # (B, C)

    def mlp(v):
        h = jnp.maximum(v @ w1.T, 0.0)                # (B, Cr)
        return h @ w2.T                               # (B, C)

    gate = jax.nn.sigmoid(mlp(avg) + mlp(mx))         # (B, C)
    return gate[:, :, None, None] * x


if __name__ == "__main__":
    # in_planes must be >= reduction_ratio (default 16); use C=32 -> C//16 = 2.
    B, C, H, W = 2, 32, 16, 16
    reduction_ratio = 16
    Cr = C // reduction_ratio

    key = jax.random.PRNGKey(0)
    kx, k1, k2 = jax.random.split(key, 3)

    x = jax.random.normal(kx, (B, C, H, W), dtype=jnp.float32)
    w1 = jax.random.normal(k1, (Cr, C), dtype=jnp.float32) * (1.0 / C) ** 0.5
    w2 = jax.random.normal(k2, (C, Cr), dtype=jnp.float32) * (1.0 / max(Cr, 1)) ** 0.5

    ref = channel_attention_ref(x, w1, w2)

    # Fast path: fused single-slab-per-batch kernel.
    out = jax.block_until_ready(channel_attention(x, w1, w2))
    assert out.shape == (B, C, H, W)
    assert jnp.allclose(out, ref, atol=1e-5, rtol=1e-5)

    # Large-shape fallback: force the two-pass (HW-tiled reduction + scale) path
    # with a tiny tile budget so it runs multiple HW tiles per batch element.
    out2 = jax.block_until_ready(
        channel_attention(x, w1, w2, force_two_pass=True,
                          two_pass_tile_bytes=16 * 1024))
    assert jnp.allclose(out2, ref, atol=1e-5, rtol=1e-5)

    # Odd spatial size exercises HW -> multiple-of-128 padding + masked max.
    x_odd = jax.random.normal(kx, (B, C, 7, 7), dtype=jnp.float32)
    ref_odd = channel_attention_ref(x_odd, w1, w2)
    out_odd = jax.block_until_ready(channel_attention(x_odd, w1, w2))
    assert jnp.allclose(out_odd, ref_odd, atol=1e-5, rtol=1e-5)

    print("KERNEL_OK")
</pallas_src>

<mosaic_0001>
module attributes {stable_mosaic.version = 11 : i64} {
  func.func @kernel(%arg0: i32, %arg1: memref<1x32x256xf32, #tpu.memory_space<vmem>>, %arg2: memref<2x32xf32, #tpu.memory_space<vmem>>, %arg3: memref<32x2xf32, #tpu.memory_space<vmem>>, %arg4: memref<1x32x256xf32, #tpu.memory_space<vmem>>) attributes {dimension_semantics = [#tpu.dimension_semantics<parallel>], iteration_bounds = array<i64: 2>, scalar_prefetch = 0 : i64, scratch_operands = 0 : i64, tpu.core_type = #tpu.core_type<tc>, window_params = [{transform_indices = @transform_0, window_bounds = array<i64: 1, 32, 256>}, {pipeline_mode = #tpu.pipeline_mode<synchronous>, transform_indices = @transform_1, window_bounds = array<i64: 2, 32>}, {pipeline_mode = #tpu.pipeline_mode<synchronous>, transform_indices = @transform_2, window_bounds = array<i64: 32, 2>}, {transform_indices = @transform_3, window_bounds = array<i64: 1, 32, 256>}]} {
    %c0 = arith.constant 0 : index
    %c0_0 = arith.constant 0 : index
    %c0_1 = arith.constant 0 : index
    %0 = vector.load %arg1[%c0, %c0_0, %c0_1] : memref<1x32x256xf32, #tpu.memory_space<vmem>>, vector<1x32x256xf32>
    %1 = vector.shape_cast %0 : vector<1x32x256xf32> to vector<32x256xf32>
    %cst = arith.constant dense<0.000000e+00> : vector<32xf32>
    %2 = vector.multi_reduction <add>, %1, %cst [1] : vector<32x256xf32> to vector<32xf32>
    %3 = vector.shape_cast %2 : vector<32xf32> to vector<32x1xf32>
    %cst_2 = arith.constant dense<0xFF800000> : vector<32xf32>
    %4 = vector.multi_reduction <maximumf>, %1, %cst_2 [1] : vector<32x256xf32> to vector<32xf32>
    %5 = vector.shape_cast %4 : vector<32xf32> to vector<32x1xf32>
    %cst_3 = arith.constant 3.906250e-03 : f32
    %6 = vector.broadcast %cst_3 : f32 to vector<32x1xf32>
    %7 = arith.mulf %3, %6 : vector<32x1xf32>
    %8 = tpu.iota {dimensions = array<i32: 1>} : vector<32x2xi32>
    %c0_i32 = arith.constant 0 : i32
    %9 = vector.broadcast %c0_i32 : i32 to vector<32x2xi32>
    %10 = arith.cmpi eq, %8, %9 : vector<32x2xi32>
    %11 = vector.shape_cast %7 : vector<32x1xf32> to vector<32x1xf32>
    %12 = vector.broadcast %11 : vector<32x1xf32> to vector<32x2xf32>
    %13 = vector.shape_cast %5 : vector<32x1xf32> to vector<32x1xf32>
    %14 = vector.broadcast %13 : vector<32x1xf32> to vector<32x2xf32>
    %15 = arith.select %10, %12, %14 : vector<32x2xi1>, vector<32x2xf32>
    %c0_4 = arith.constant 0 : index
    %c0_5 = arith.constant 0 : index
    %16 = vector.load %arg2[%c0_4, %c0_5] : memref<2x32xf32, #tpu.memory_space<vmem>>, vector<2x32xf32>
    %c0_6 = arith.constant 0 : index
    %c0_7 = arith.constant 0 : index
    %17 = vector.load %arg3[%c0_6, %c0_7] : memref<32x2xf32, #tpu.memory_space<vmem>>, vector<32x2xf32>
    %cst_8 = arith.constant dense<0.000000e+00> : vector<2x2xf32>
    %18 = tpu.matmul %16, %15, %cst_8 {dimension_numbers = #tpu.dot_dimension_numbers<[1], [0], [0], [1], [0, 0, 1, 1], [], []>} : vector<2x32xf32>, vector<32x2xf32>, vector<2x2xf32> -> vector<2x2xf32>
    %cst_9 = arith.constant 0.000000e+00 : f32
    %19 = vector.broadcast %cst_9 : f32 to vector<2x2xf32>
    %20 = arith.maximumf %18, %19 : vector<2x2xf32>
    %cst_10 = arith.constant dense<0.000000e+00> : vector<32x2xf32>
    %21 = tpu.matmul %17, %20, %cst_10 {dimension_numbers = #tpu.dot_dimension_numbers<[1], [0], [0], [1], [0, 0, 1, 1], [], []>} : vector<32x2xf32>, vector<2x2xf32>, vector<32x2xf32> -> vector<32x2xf32>
    %cst_11 = arith.constant dense<0.000000e+00> : vector<32xf32>
    %22 = vector.multi_reduction <add>, %21, %cst_11 [1] : vector<32x2xf32> to vector<32xf32>
    %23 = vector.shape_cast %22 : vector<32xf32> to vector<32x1xf32>
    %24 = arith.negf %23 : vector<32x1xf32>
    %25 = math.exp %24 : vector<32x1xf32>
    %cst_12 = arith.constant 1.000000e+00 : f32
    %26 = vector.broadcast %cst_12 : f32 to vector<32x1xf32>
    %27 = arith.addf %26, %25 : vector<32x1xf32>
    %28 = arith.divf %26, %27 : vector<32x1xf32>
    %29 = vector.broadcast %28 : vector<32x1xf32> to vector<32x256xf32>
    %30 = arith.mulf %1, %29 : vector<32x256xf32>
    %c0_13 = arith.constant 0 : index
    %c0_14 = arith.constant 0 : index
    %c0_15 = arith.constant 0 : index
    %31 = vector.load %arg4[%c0_13, %c0_14, %c0_15] : memref<1x32x256xf32, #tpu.memory_space<vmem>>, vector<1x32x256xf32>
    %32 = vector.shape_cast %31 : vector<1x32x256xf32> to vector<32x256xf32>
    %33 = vector.shape_cast %30 : vector<32x256xf32> to vector<1x32x256xf32>
    tpu.vector_store %arg4[%c0_13, %c0_14, %c0_15], %33 {strides = array<i32>} : memref<1x32x256xf32, #tpu.memory_space<vmem>>, vector<1x32x256xf32>,
    return
  }
  func.func @transform_0(%arg0: i32) -> (i32, i32, i32) {
    %c0_i32 = arith.constant 0 : i32
    %c0_i32_0 = arith.constant 0 : i32
    %c0_i32_1 = arith.constant 0 : i32
    return %arg0, %c0_i32, %c0_i32_0 : i32, i32, i32
  }
  func.func @transform_1(%arg0: i32) -> (i32, i32) {
    %c0_i32 = arith.constant 0 : i32
    %c0_i32_0 = arith.constant 0 : i32
    %c0_i32_1 = arith.constant 0 : i32
    return %c0_i32, %c0_i32_0 : i32, i32
  }
  func.func @transform_2(%arg0: i32) -> (i32, i32) {
    %c0_i32 = arith.constant 0 : i32
    %c0_i32_0 = arith.constant 0 : i32
    %c0_i32_1 = arith.constant 0 : i32
    return %c0_i32, %c0_i32_0 : i32, i32
  }
  func.func @transform_3(%arg0: i32) -> (i32, i32, i32) {
    %c0_i32 = arith.constant 0 : i32
    %c0_i32_0 = arith.constant 0 : i32
    %c0_i32_1 = arith.constant 0 : i32
    return %arg0, %c0_i32, %c0_i32_0 : i32, i32, i32
  }
}

</mosaic_0001>

<bundles_post_ra>
// kernel: tpu_custom_call.1
= control target key start
LH: loop header
LB: loop body
LE: loop exit
PB: predicated region body
PF: predicated region fallthrough
CT: control target
= control target key end

     0   :  { %8 = vsyncpa [#allocation3], 0  ;;  %s1039_s0 = inlined_call_operand.hbm [shape: f32[2,32,256], index: 0, kind: input, shape index: {}]   ;;  %s1040_s1 = inlined_call_operand.vmem [shape: f32[2,32], index: 1, kind: input, shape index: {}]   ;;  %s1041_s2 = inlined_call_operand.vmem [shape: f32[32,2], index: 2, kind: input, shape index: {}]   ;;  %s1042_s3 = inlined_call_operand.hbm [shape: f32[2,32,256], index: 3, kind: output, shape index: {}]  }
   0x1   :  { %10 = vsyncpa [#allocation3 + $0x1], 0 }
   0x2   :  { %11 = vsyncpa [#allocation4], 0 }
   0x3   :  { %13 = vsyncpa [#allocation4 + $0x1], 0  ;;  %s810_s12 = smov 0   ;;  %s812_s13 = smov 0  }
   0x4   :  { %s814_s14 = smov 0   ;;  %s816_s15 = smov 0  }
   0x5 LB: > { %s831_s16 = sadd.s32 4294967295, %s779_s15   ;;  %s553_s17 = sadd.s32 4294967294, %s779_s15   ;;  %s779_s15 = sphi %s816_s15, %s1055_s15   ;;  %s775_s14 = sphi %s814_s14, %s1054_s14   ;;  %s771_s13 = sphi %s812_s13, %s1053_s13   ;;  %s767_s12 = sphi %s810_s12, %s1052_s12  }
   0x6   : > { %s835_s18 = sadd.s32 1, %s779_s15   ;;  %s26_s19 = sadd.s32 1, %s775_s14 }
   0x7   : > { %s23_s20 = ssub.s32 %s779_s15, %s835_s18  ;;  %p33_p0 = scmp.ne.s32.totalorder %s775_s14, %s771_s13 }
   0x8   : > { %p24_p1 = scmp.eq.s32.totalorder %s23_s20, 0  ;;  %p34_p2 = scmp.eq.s32.totalorder %s779_s15, 0 }
   0x9   : > { %p39_p3 = scmp.ne.s32.totalorder %s771_s13, %s767_s12  ;;  %p40_p4 = scmp.eq.s32.totalorder %s831_s16, 0 }
   0xa   : > { %s847_s21 = scalar_select %p24_p1, %s775_s14, %s26_s19  }
   0xb   : > { %p849_p5 = por %p34_p2, %p33_p0  ;;  %p853_p6 = por %p40_p4, %p39_p3 }
   0xc   : > { %p105_p7 = scmp.eq.s32.totalorder %s831_s16, 1  ;;  %p111_p8 = scmp.eq.s32.totalorder %s553_s17, 1 }
   0xd   : > { %p626_p10 = scmp.lt.s32.totalorder %s779_s15, 2  ;;  %s137_s26 = sand.u32 1, %s775_s14  }
   0xe   : > { %p860_p11 = por %p105_p7, %p33_p0  ;;  %p864_p12 = por %p111_p8, %p39_p3 }
   0xf   : > { %s577_s27 = sshll.u32 %s779_s15, 10  ;;  %s556_s28 = sshll.u32 %s137_s26, 6 }
  0x10   : > { %s1046_s24 = scalar_select %p860_p11, 1, 0 }
  0x11   : > { %s1047_s25 = scalar_select %p864_p12, 1, 0 }
  0x12   : > { %s873_s4 = scalar_lea.hbm %s1039_s0, %s577_s27  ;;  %s141_s5 = scalar_lea.vmem [#allocation2], %s556_s28 }
  0x13   : > { %s148_s6 = sshll.u32 %s141_s5, 4  ;;  %p877_p13 = pnand %p626_p10, %p849_p5  ;;  %s881_s6 = int_to_ptr.vmem [resolvable:$true] %s148_s6 }
  0x14   : > { %s883_s8 = scalar_lea.sflag [#allocation3], %s137_s26  ;;  %s683_s9 = scalar_lea.hbm %s873_s4, 1024 }
  0x15   : > { %p684_p0 = scmp.ne.s32.totalorder %s873_s4, %s683_s9  ;;  %p685_p1 = pneg %p877_p13 }
  0x16   : > { %s688_s17 = scalar_lea.hbm %s1039_s0, 2048  ;;  %p689_p4 = scmp.lt.u32.totalorder %s873_s4, %s1039_s0 }
  0x17   : > { %p686_p2 = pnand %p685_p1, %p684_p0  ;;  %p690_p5 = scmp.lt.u32.totalorder %s688_s17, %s683_s9 }
  0x18   : > { %p692_p8 = scmp.lt.u32.totalorder %s683_s9, %s873_s4 }
  0x19   : > { %p687_p3 = pneg %p686_p2  ;;  %p691_p7 = por %p690_p5, %p689_p4 }
  0x1b   : > { %p693_p10 = por %p692_p8, %p691_p7 }
  0x1d   : > { %p694_p9 = pnand %p693_p10, %p687_p3 }
  0x1f   : > { %697 = shalt.err (!%p694_p9)
}
  0x20   : > { %s698_s22 = scalar_lea.vmem %s881_s6, 1024  ;;  %s781_s26 = smov [#allocation2]  }
  0x21   : > { %p699_p0 = scmp.ne.s32.totalorder %s881_s6, %s698_s22  ;;  %s703_s27 = sshll.u32 %s781_s26, 4  ;;  %s704_s27 = int_to_ptr.vmem [resolvable:$false] %s703_s27 }
  0x22   : > { %s705_s28 = scalar_lea.vmem %s704_s27, 2048  ;;  %p706_p11 = scmp.lt.s32.totalorder %s881_s6, %s704_s27 }
  0x23   : > { %p701_p2 = pnand %p699_p0, %p685_p1  ;;  %p707_p4 = scmp.lt.s32.totalorder %s705_s28, %s698_s22 }
  0x25   : > { %p702_p12 = pneg %p701_p2  ;;  %p708_p5 = por %p707_p4, %p706_p11 }
  0x27   : > { %p709_p7 = pnand %p708_p5, %p702_p12 }
  0x29   : > { %712 = shalt.err (!%p709_p7)
}
  0x2a   : > { %s782_s29 = smov 256   ;;  %s783_s30 = smov 16  }
  0x2b   : > { %621 = dma.hbm_to_vmem [thread:$0]  (!%p877_p13), %s873_s4, 1024, %s881_s6, %s883_s8, %s782_s29, %s782_s29, %s783_s30  }
  0x2c   : > { %p559_p9 = scmp.ge.s32.totalorder %s779_s15, 1  ;;  %p156_p1 = scmp.lt.s32.totalorder %s779_s15, 3 }
  0x2e   : > { %p157_p3 = pnand %p559_p9, %p156_p1 }
  0x2f   : > { %s914_s5 = sand.u32 (!%p157_p3), 1, %s771_s13  }
  0x30   : > { %160 = sbr.rel (%p157_p3) target bundleno = 838 (0x346), region = 32  ;;  %s560_s9 = sshll.u32 (!%p157_p3), %s914_s5, 6 }
  0x31   : > { %s163_s10 = scalar_lea.sflag (!%p157_p3), [#allocation3], %s914_s5  ;;  %s166_s11 = scalar_lea.vmem (!%p157_p3), [#allocation2], %s560_s9 }
  0x37   : > { %758 = dma.done.wait (%p853_p6), %s163_s10, 1024  }
  0x38   : > { %760 = vsyncadd (%p853_p6), %s163_s10, 4294966272  ;;  %v924_v0 = vld [vmem:[%s166_s11] sm:$0xff]  ;;  %v926_v1 = vld [vmem:[%s166_s11 + $0x8] sm:$0xff]  ;;  %v784_v16 = vmov 0.0|0.0   ;;  %vm785_vm0 = vmmov 0   ;;  %v786_v17 = vmov 0.0   ;;  %v225_v18 = vlaneseq }
  0x39   : > { %v928_v2 = vld [vmem:[%s166_s11 + $0x10] sm:$0xff]  ;;  %v209_v3 = vmax.f32 %v924_v0, %v926_v1  ;;  %v197_v4 = vadd.f32 %v926_v1, %v924_v0  ;;  %v934_v5 = vld [vmem:[%s166_s11 + $0x18] sm:$0xff]  ;;  %v944_v10 = vld [vmem:[%s166_s11 + $0x20] sm:$0xff]  ;;  %608 = vmatprep.subr.bf16.mxu0 %v784_v16  ;;  %597 = vmatprep.mubr.msk.f32.mxu0 %vm785_vm0, %v786_v17  ;;  %vm237_vm2 = vcmask 261120   ;;  %vm312_vm3 = vcmask 15360   ;;  %s578_s27 = sshll.u32 %s831_s16, 10 }
  0x3a   : > { %v212_v6 = vmax.f32 %v928_v2, %v934_v5  ;;  %v200_v7 = vadd.f32 %v934_v5, %v928_v2  ;;  %v940_v8 = vld [vmem:[%s166_s11 + $0x30] sm:$0xff]  ;;  %v942_v9 = vld [vmem:[%s166_s11 + $0x38] sm:$0xff]  ;;  %v946_v11 = vld [vmem:[%s166_s11 + $0x28] sm:$0xff]  ;;  %v226_v21 = vand.u32 127, %v225_v18  ;;  %vm325_vm4 = vcmask 1041408   ;;  %s188_s28 = scalar_lea.vmem [#allocation5], %s560_s9  ;;  %s991_s11 = scalar_lea.hbm %s1042_s3, %s578_s27 }
  0x3b   : > { %210 = vmax.xlane.f32.xlu1 %v209_v3  ;;  %198 = vadd.xlane.f32.xlu0 %v197_v4  ;;  %v206_v12 = vadd.f32 %v942_v9, %v940_v8  ;;  %v203_v13 = vadd.f32 %v946_v11, %v944_v10  ;;  %v218_v14 = vmax.f32 %v940_v8, %v942_v9  ;;  %v232_v38 = vld [vmem:[%s1040_s1] sm:$0x3]  ;;  %v234_v43 = vld [vmem:[%s1041_s2 + $0x8] sm:$0xff]  ;;  %v235_v44 = vld [vmem:[%s1041_s2 + $0x10] sm:$0xff]  ;;  %s480_s29 = sshll.u32 %s188_s28, 4  ;;  %s467_s16 = scalar_lea.sflag [#allocation4], %s914_s5  ;;  %s993_s29 = int_to_ptr.vmem [resolvable:$true] %s480_s29 }
  0x3c   : > { %v215_v15 = vmax.f32 %v944_v10, %v946_v11  ;;  %vm227_vm1 = vcmp.eq.s32.totalorder %v226_v21, 0  ;;  %v233_v39 = vld [vmem:[%s1041_s2] sm:$0xff]  ;;  %v236_v45 = vld [vmem:[%s1041_s2 + $0x18] sm:$0xff]  ;;  %s713_s9 = scalar_lea.vmem %s993_s29, 1024  ;;  %p1049_p11 = scmp.ne.s32.totalorder %s1046_s24, 0 }
  0x3d   : > { %602 = vmatprep.mubr.msk.f32.mxu1 %vm312_vm3, %v233_v39  ;;  %p714_p6 = scmp.ne.s32.totalorder %s993_s29, %s713_s9  ;;  %s787_s23 = smov [#allocation5]  }
  0x3e   : > { %s717_s4 = sshll.u32 %s787_s23, 4  ;;  %s718_s4 = int_to_ptr.vmem [resolvable:$false] %s717_s4 }
  0x3f   : > { %213 = vmax.xlane.f32.xlu1 %v212_v6  ;;  %201 = vadd.xlane.f32.xlu0 %v200_v7  ;;  %p715_p12 = pnand %p714_p6, %p1049_p11  ;;  %s719_s6 = scalar_lea.vmem %s718_s4, 2048 }
  0x40   : > { %p720_p8 = scmp.lt.s32.totalorder %s993_s29, %s718_s4  ;;  %p721_p10 = scmp.lt.s32.totalorder %s719_s6, %s713_s9 }
  0x41   : > { %p716_p13 = pneg %p715_p12 }
  0x42   : > { %p722_p0 = por %p721_p10, %p720_p8 }
  0x43   : > { %207 = vadd.xlane.f32.xlu1 %v206_v12  ;;  %204 = vadd.xlane.f32.xlu0 %v203_v13 }
  0x44   : > { %p723_p2 = pnand %p722_p0, %p716_p13 }
  0x47   : > { %219 = vmax.xlane.f32.xlu1 %v218_v14  ;;  %216 = vmax.xlane.f32.xlu0 %v215_v15 }
  0xc8   : > { %v211_v19 = vpop.xlane.xlu1 %210  ;;  %v199_v20 = vpop.xlane.xlu0 %198 }
  0xc9   : > { %v221_v22 = vmul.f32 0.00390625, %v199_v20 }
  0xcb   : > { %v228_v26 = vsel %vm227_vm1, %v221_v22, %v211_v19 }
  0xcc   : > { %v214_v23 = vpop.xlane.xlu1 %213  ;;  %v202_v24 = vpop.xlane.xlu0 %201 }
  0xcd   : > { %v222_v25 = vmul.f32 0.00390625, %v202_v24 }
  0xcf   : > { %v229_v27 = vsel %vm227_vm1, %v222_v25, %v214_v23 }
  0xd0   : > { %v208_v28 = vpop.xlane.xlu1 %207  ;;  %v205_v29 = vpop.xlane.xlu0 %204  ;;  %v609_v30 = vpack.c.bf16 %v229_v27, %v228_v26 }
  0xd1   : > { %v224_v31 = vmul.f32 0.00390625, %v208_v28  ;;  %v223_v32 = vmul.f32 0.00390625, %v205_v29 }
  0xd2   : > { %610 = vmatpush3.bf16.msra.mxu0 %v609_v30 }
  0xd3   : > { %611 = vmatprep.subr.bf16.mxu0 %v784_v16 }
  0xd4   : > { %v220_v33 = vpop.xlane.xlu1 %219  ;;  %v217_v34 = vpop.xlane.xlu0 %216 }
  0xd5   : > { %v231_v35 = vsel %vm227_vm1, %v224_v31, %v220_v33  ;;  %v230_v36 = vsel %vm227_vm1, %v223_v32, %v217_v34 }
  0xd6   : > { %v612_v37 = vpack.c.bf16 %v231_v35, %v230_v36 }
  0xd8   : > { %613 = vmatpush3.bf16.msra.mxu0 %v612_v37 }
  0xdb   : > { %598 = vmatmul.mubr.msk.f32.vlgmr.msra.gmra.mrb[0].mxu0 %vm237_vm2, %v232_v38 }
 0x1ae   : > { %v307_v40 = vpop.f32.mrb[0].mxu0 }
 0x1af   : > { %v311_v41 = vmax.f32 %v307_v40, 0.0  ;;  %v599_v42 = vpop.f32.mrb[1].mxu0 }
 0x1b1   : > { %600 = vmatprep.subr.msk.mxu1 %vm325_vm4, %v311_v41 }
 0x1b2   : > { %601 = vmatpush3.msk.msra.mxu1 %vm325_vm4, %v311_v41 }
 0x1b3   : > { %603 = vmatmul.mubr.msk.f32.vlgmr.msra.gmra.mrb[0].mxu1 %vm312_vm3, %v234_v43 }
 0x1b4   : > { %605 = vmatprep.mubr.msk.f32.mxu1 %vm312_vm3, %v235_v44 }
 0x1b7   : > { %606 = vmatmul.mubr.msk.f32.gmra.mrb[2].mxu1 %vm312_vm3, %v236_v45 }
 0x286   : > { %v604_v46 = vpop.f32.mrb[0].mxu1 }
 0x287   : > { %v395_v47 = vpop.f32.mrb[1].mxu1  ;;  %v417_v48 = vsel %vm312_vm3, %v604_v46, 0.0 }
 0x288   : > { %418 = vadd.xlane.f32.xlu1 %v417_v48  ;;  %v414_v49 = vsel %vm312_vm3, %v395_v47, 0.0 }
 0x289   : > { %415 = vadd.xlane.f32.xlu0 %v414_v49 }
 0x28a   : > { %v607_v50 = vpop.f32.mrb[2].mxu1 }
 0x28b   : > { %v405_v51 = vpop.f32.mrb[3].mxu1  ;;  %v423_v52 = vsel %vm312_vm3, %v607_v50, 0.0 }
 0x28c   : > { %424 = vadd.xlane.f32.xlu1 %v423_v52  ;;  %v420_v53 = vsel %vm312_vm3, %v405_v51, 0.0 }
 0x28d   : > { %421 = vadd.xlane.f32.xlu0 %v420_v53 }
 0x315   : > { %v419_v54 = vpop.xlane.xlu1 %418 }
 0x316   : > { %v569_v55 = vmul.f32 -1.442695, %v419_v54  ;;  %v416_v56 = vpop.xlane.xlu0 %415 }
 0x317   : > { %v568_v57 = vmul.f32 -1.442695, %v416_v56 }
 0x318   : > { %667 = vpow2.f32 %v569_v55 }
 0x319   : > { %669 = vpow2.f32 %v568_v57  ;;  %v425_v58 = vpop.xlane.xlu1 %424 }
 0x31a   : > { %v571_v59 = vmul.f32 -1.442695, %v425_v58  ;;  %v422_v60 = vpop.xlane.xlu0 %421 }
 0x31b   : > { %v570_v61 = vmul.f32 -1.442695, %v422_v60 }
 0x31c   : > { %671 = vpow2.f32 %v571_v59 }
 0x31d   : > { %673 = vpow2.f32 %v570_v61 }
 0x322   : > { %v668_v62 = vpop.eup %667 }
 0x323   : > { %v670_v63 = vpop.eup %669  ;;  %v439_v3 = vadd.f32 1.0, %v668_v62 }
 0x324   : > { %v438_v4 = vadd.f32 1.0, %v670_v63 }
 0x325   : > { %675 = vrcp.f32 %v439_v3 }
 0x326   : > { %v672_v6 = vpop.eup %671  ;;  %677 = vrcp.f32 %v438_v4 }
 0x327   : > { %v674_v7 = vpop.eup %673  ;;  %v441_v12 = vadd.f32 1.0, %v672_v6 }
 0x328   : > { %v440_v13 = vadd.f32 1.0, %v674_v7 }
 0x329   : > { %679 = vrcp.f32 %v441_v12 }
 0x32a   : > { %681 = vrcp.f32 %v440_v13 }
 0x32f   : > { %v676_v14 = vpop.eup %675 }
 0x330   : > { %v678_v15 = vpop.eup %677  ;;  %v452_v16 = vmul.f32 %v676_v14, %v928_v2  ;;  %v453_v17 = vmul.f32 %v676_v14, %v934_v5 }
 0x331   : > { %v450_v18 = vmul.f32 %v678_v15, %v924_v0  ;;  %v451_v19 = vmul.f32 %v678_v15, %v926_v1 }
 0x332   : > { %460 = vst [vmem:[%s188_s28 + $0x10] sm:$0xff] %v452_v16  ;;  %461 = vst [vmem:[%s188_s28 + $0x18] sm:$0xff] %v453_v17 }
 0x333   : > { %v680_v20 = vpop.eup %679  ;;  %458 = vst [vmem:[%s188_s28] sm:$0xff] %v450_v18  ;;  %459 = vst [vmem:[%s188_s28 + $0x8] sm:$0xff] %v451_v19 }
 0x334   : > { %v682_v21 = vpop.eup %681  ;;  %v456_v2 = vmul.f32 %v680_v20, %v940_v8  ;;  %v457_v5 = vmul.f32 %v680_v20, %v942_v9 }
 0x335   : > { %v454_v0 = vmul.f32 %v682_v21, %v944_v10  ;;  %v455_v1 = vmul.f32 %v682_v21, %v946_v11 }
 0x336   : > { %464 = vst [vmem:[%s188_s28 + $0x30] sm:$0xff] %v456_v2  ;;  %465 = vst [vmem:[%s188_s28 + $0x38] sm:$0xff] %v457_v5 }
 0x337   : > { %462 = vst [vmem:[%s188_s28 + $0x20] sm:$0xff] %v454_v0  ;;  %463 = vst [vmem:[%s188_s28 + $0x28] sm:$0xff] %v455_v1 }
 0x338   : > { %726 = shalt.err (!%p723_p2)
}
 0x339   : > { %s727_s7 = scalar_lea.hbm %s991_s11, 1024  ;;  %s731_s19 = scalar_lea.hbm %s1042_s3, 2048 }
 0x33a   : > { %p728_p4 = scmp.ne.s32.totalorder %s991_s11, %s727_s7  ;;  %p732_p9 = scmp.lt.u32.totalorder %s991_s11, %s1042_s3 }
 0x33b   : > { %p733_p1 = scmp.lt.u32.totalorder %s731_s19, %s727_s7  ;;  %p735_p6 = scmp.lt.u32.totalorder %s727_s7, %s991_s11 }
 0x33c   : > { %p729_p5 = pnand %p728_p4, %p1049_p11 }
 0x33d   : > { %p734_p3 = por %p733_p1, %p732_p9 }
 0x33e   : > { %p730_p7 = pneg %p729_p5 }
 0x33f   : > { %p736_p12 = por %p735_p6, %p734_p3 }
 0x341   : > { %p737_p13 = pnand %p736_p12, %p730_p7 }
 0x343   : > { %740 = shalt.err (!%p737_p13)
}
 0x344   : > { %s788_s26 = smov 256   ;;  %s789_s27 = smov 16  }
 0x345   : > { %616 = dma.vmem_to_hbm [thread:$0]  (%p1049_p11), %s993_s29, 1024, %s991_s11, %s467_s16, %s788_s26, %s788_s26, %s789_s27  }
 0x346 PF: > { %s495_s28 = sand.u32 1, %s767_s12   ;;  %p1050_p8 = scmp.ne.s32.totalorder %s1047_s25, 0 }
 0x347   : > { %p1051_p10 = scmp.ge.s32.totalorder %s779_s15, 2  ;;  %s496_s30 = scalar_lea.sflag [#allocation4], %s495_s28 }
 0x349   : > { %p623_p0 = pnand %p1051_p10, %p1050_p8 }
 0x34b   : > { %762 = dma.done.wait (!%p623_p0), %s496_s30, 1024  }
 0x34c   : > { %764 = vsyncadd (!%p623_p0), %s496_s30, 4294966272  ;;  %p16_p2 = scmp.ge.s32.totalorder %s835_s18, 4   ;;  %s1052_s12 = smov %s771_s13 }
 0x34d   : > { %s1053_s13 = smov %s775_s14  ;;  %s1054_s14 = smov %s847_s21 }
 0x34e   : > { %s1055_s15 = smov %s835_s18  ;;  %18 = sbr.rel (!%p16_p2) target bundleno = 5 (0x5), region = 77 }
 0x355   :  { %501 = vsyncpa [#allocation3], 1 }
 0x356   :  { %503 = vsyncpa [#allocation3 + $0x1], 1 }
 0x357   :  { %504 = vsyncpa [#allocation4], 1 }
 0x358   :  { %506 = vsyncpa [#allocation4 + $0x1], 1 }

</bundles_post_ra>
